<compile_context>
chip_gen: v6e
topology: v6e:2x2x1
jax: 0.10.0
libtpu: 0.0.40
codegen_flags: <defaults>
</compile_context>

<pallas_src>
import jax
import jax.numpy as jnp
from jax.experimental import pallas as pl
from jax.experimental.pallas import tpu as pltpu

LANE = 128


def _round_up(x, m):
    return ((x + m - 1) // m) * m


# ---------------------------------------------------------------------------
# Pallas kernel: fused embedding gather + backbone Linear+ReLU + 3-layer MLP.
# All weights live fully in VMEM (tiny); tokens are tiled by tm on sublanes.
# ---------------------------------------------------------------------------
def ner_fused_kernel(ids_ref, table_ref,
                     wbb_ref, bbb_ref,
                     w1_ref, b1_ref,
                     w2_ref, b2_ref,
                     w3_ref, b3_ref,
                     o_ref):
    tm = ids_ref.shape[0]
    vocab_p = table_ref.shape[0]

    # Embedding lookup as a one-hot matmul on the MXU.  Ids that are out of
    # range (padding id -1, or rows added to pad N up to a tile multiple) give
    # an all-zero one-hot row -> zero embedding, matching padding_idx=-1.
    ids = ids_ref[...]                                                # (tm, 1) i32
    lane_iota = jax.lax.broadcasted_iota(jnp.int32, (tm, vocab_p), 1)
    onehot = (lane_iota == ids).astype(jnp.bfloat16)                  # (tm, Vp)
    emb = jnp.dot(onehot, table_ref[...],
                  preferred_element_type=jnp.float32)                 # (tm, E) f32

    # backbone stand-in: Linear + ReLU  (bf16 matmul inputs, f32 accumulate,
    # bias/ReLU kept in f32 for the VPU).
    h = jnp.dot(emb.astype(jnp.bfloat16), wbb_ref[...],
                preferred_element_type=jnp.float32) + bbb_ref[...]
    h = jnp.maximum(h, 0.0)

    # classifier layer 1 (dropout == identity at inference)
    h = jnp.dot(h.astype(jnp.bfloat16), w1_ref[...],
                preferred_element_type=jnp.float32) + b1_ref[...]
    h = jnp.maximum(h, 0.0)

    # classifier layer 2
    h = jnp.dot(h.astype(jnp.bfloat16), w2_ref[...],
                preferred_element_type=jnp.float32) + b2_ref[...]
    h = jnp.maximum(h, 0.0)

    # classifier output layer (Identity activation).  Output is 128-lane padded
    # (zero weight columns); real logits live in [:, :num_tags+2].
    out = jnp.dot(h.astype(jnp.bfloat16), w3_ref[...],
                  preferred_element_type=jnp.float32) + b3_ref[...]
    o_ref[...] = out.astype(o_ref.dtype)


def ner_crf_forward(input_ids, params, *, tm_max=1024):
    """Inference forward pass of NER_CRF (labels=None) -> logits."""
    emb_table = params["emb_table"]          # [vocab, emb_dim] f32
    wbb, bbb = params["wbb"], params["bbb"]  # [emb_dim, hidden], [1, hidden]
    w1, b1 = params["w1"], params["b1"]      # [hidden, m1],     [1, m1]
    w2, b2 = params["w2"], params["b2"]      # [m1, m2],         [1, m2]
    w3, b3 = params["w3"], params["b3"]      # [m2, out_dim],    [1, out_dim]

    B, S = input_ids.shape
    N = B * S
    vocab, emb_dim = emb_table.shape
    m2 = w2.shape[1]
    out_dim = w3.shape[1]

    # Row tile: as big as reasonable (per-grid-step overhead ~0.35us), but keep
    # at least 2 grid steps whenever N permits so v7x's two TensorCores both
    # get work.  Everything still fits comfortably in default scoped VMEM.
    tm = min(tm_max, _round_up(max(N // 2, 8), 8))
    N_pad = _round_up(N, tm)

    # ---- parameter preparation (bf16 weights, lane-padded output layer) ----
    vocab_p = _round_up(vocab, LANE)
    table_bf = jnp.zeros((vocab_p, emb_dim), jnp.bfloat16)
    table_bf = table_bf.at[:vocab].set(emb_table.astype(jnp.bfloat16))

    out_dim_p = _round_up(out_dim, LANE)
    w3p = jnp.zeros((m2, out_dim_p), jnp.bfloat16)
    w3p = w3p.at[:, :out_dim].set(w3.astype(jnp.bfloat16))
    b3p = jnp.zeros((1, out_dim_p), jnp.float32)
    b3p = b3p.at[:, :out_dim].set(b3.astype(jnp.float32))

    wbb_bf = wbb.astype(jnp.bfloat16); bbb_f = bbb.astype(jnp.float32)
    w1_bf = w1.astype(jnp.bfloat16);   b1_f = b1.astype(jnp.float32)
    w2_bf = w2.astype(jnp.bfloat16);   b2_f = b2.astype(jnp.float32)

    # Token ids, padded up to N_pad with -1 (-> zero embedding, sliced off).
    ids = input_ids.reshape(-1).astype(jnp.int32)
    ids = jnp.pad(ids, (0, N_pad - N), constant_values=-1).reshape(N_pad, 1)

    full = lambda a: pl.BlockSpec(a.shape, lambda i: (0, 0))

    logits_padded = pl.pallas_call(
        ner_fused_kernel,
        out_shape=jax.ShapeDtypeStruct((N_pad, out_dim_p), jnp.float32),
        grid=(N_pad // tm,),
        in_specs=[
            pl.BlockSpec((tm, 1), lambda i: (i, 0)),   # token-id tile
            full(table_bf),
            full(wbb_bf), full(bbb_f),
            full(w1_bf), full(b1_f),
            full(w2_bf), full(b2_f),
            full(w3p), full(b3p),
        ],
        out_specs=pl.BlockSpec((tm, out_dim_p), lambda i: (i, 0)),
        compiler_params=pltpu.CompilerParams(
            dimension_semantics=("parallel",)),
    )(ids, table_bf, wbb_bf, bbb_f, w1_bf, b1_f, w2_bf, b2_f, w3p, b3p)

    logits = logits_padded[:N, :out_dim].reshape(B, S, out_dim)
    return {"logits": logits}


# ---------------------------------------------------------------------------
# Deterministic parameter construction (synthetic init, no checkpoint).
# ---------------------------------------------------------------------------
def make_params(vocab_size, emb_dim, hidden, mlp_dims, num_tags):
    key = jax.random.PRNGKey(0)
    keys = jax.random.split(key, 10)

    def lin(kw, fan_in, fan_out):
        scale = 1.0 / jnp.sqrt(jnp.float32(fan_in))
        w = jax.random.uniform(kw, (fan_in, fan_out), jnp.float32, -scale, scale)
        b = jnp.zeros((1, fan_out), jnp.float32)
        return w, b

    emb_table = jax.random.normal(keys[0], (vocab_size, emb_dim), jnp.float32)
    # padding_idx = -1  ->  row (vocab_size - 1) is zero.
    emb_table = emb_table.at[vocab_size - 1].set(0.0)

    m1, m2 = mlp_dims
    out_dim = num_tags + 2
    wbb, bbb = lin(keys[1], emb_dim, hidden)
    w1, b1 = lin(keys[2], hidden, m1)
    w2, b2 = lin(keys[3], m1, m2)
    w3, b3 = lin(keys[4], m2, out_dim)

    return dict(emb_table=emb_table, wbb=wbb, bbb=bbb,
                w1=w1, b1=b1, w2=w2, b2=b2, w3=w3, b3=b3)


if __name__ == "__main__":
    # Small config: vocab=100, emb_dim=32, hidden=32, mlp_dims=[64,32], num_tags=9
    vocab_size, emb_dim, hidden = 100, 32, 32
    mlp_dims, num_tags = [64, 32], 9
    B, S = 2, 8

    params = make_params(vocab_size, emb_dim, hidden, mlp_dims, num_tags)

    key = jax.random.PRNGKey(0)
    input_ids = jax.random.randint(key, (B, S), 0, vocab_size, dtype=jnp.int32)

    out = ner_crf_forward(input_ids, params)
    logits = jax.block_until_ready(out["logits"])

    # Reference in plain JAX, mirroring the kernel's bf16-weight / f32-accumulate
    # numerics.
    def mm(x, w):
        return jnp.dot(x.astype(jnp.bfloat16), w.astype(jnp.bfloat16),
                       preferred_element_type=jnp.float32)

    ids_flat = input_ids.reshape(-1)
    emb = jnp.take(params["emb_table"].astype(jnp.bfloat16), ids_flat,
                   axis=0).astype(jnp.float32)
    h = jnp.maximum(mm(emb, params["wbb"]) + params["bbb"], 0.0)
    h = jnp.maximum(mm(h, params["w1"]) + params["b1"], 0.0)
    h = jnp.maximum(mm(h, params["w2"]) + params["b2"], 0.0)
    ref = (mm(h, params["w3"]) + params["b3"]).reshape(B, S, num_tags + 2)

    assert logits.shape == (B, S, num_tags + 2)
    assert jnp.allclose(logits, ref, atol=1e-2, rtol=1e-2), \
        f"max abs diff {jnp.max(jnp.abs(logits - ref))}"
    print("KERNEL_OK")
</pallas_src>

<mosaic_0001>
module attributes {stable_mosaic.version = 11 : i64} {
  func.func @ner_fused_kernel(%arg0: i32, %arg1: memref<8x1xi32, #tpu.memory_space<vmem>>, %arg2: memref<128x32xbf16, #tpu.memory_space<vmem>>, %arg3: memref<32x32xbf16, #tpu.memory_space<vmem>>, %arg4: memref<1x32xf32, #tpu.memory_space<vmem>>, %arg5: memref<32x64xbf16, #tpu.memory_space<vmem>>, %arg6: memref<1x64xf32, #tpu.memory_space<vmem>>, %arg7: memref<64x32xbf16, #tpu.memory_space<vmem>>, %arg8: memref<1x32xf32, #tpu.memory_space<vmem>>, %arg9: memref<32x128xbf16, #tpu.memory_space<vmem>>, %arg10: memref<1x128xf32, #tpu.memory_space<vmem>>, %arg11: memref<8x128xf32, #tpu.memory_space<vmem>>) attributes {dimension_semantics = [#tpu.dimension_semantics<parallel>], iteration_bounds = array<i64: 2>, scalar_prefetch = 0 : i64, scratch_operands = 0 : i64, tpu.core_type = #tpu.core_type<tc>, window_params = [{transform_indices = @transform_0, window_bounds = array<i64: 8, 1>}, {pipeline_mode = #tpu.pipeline_mode<synchronous>, transform_indices = @transform_1, window_bounds = array<i64: 128, 32>}, {pipeline_mode = #tpu.pipeline_mode<synchronous>, transform_indices = @transform_2, window_bounds = array<i64: 32, 32>}, {pipeline_mode = #tpu.pipeline_mode<synchronous>, transform_indices = @transform_3, window_bounds = array<i64: 1, 32>}, {pipeline_mode = #tpu.pipeline_mode<synchronous>, transform_indices = @transform_4, window_bounds = array<i64: 32, 64>}, {pipeline_mode = #tpu.pipeline_mode<synchronous>, transform_indices = @transform_5, window_bounds = array<i64: 1, 64>}, {pipeline_mode = #tpu.pipeline_mode<synchronous>, transform_indices = @transform_6, window_bounds = array<i64: 64, 32>}, {pipeline_mode = #tpu.pipeline_mode<synchronous>, transform_indices = @transform_7, window_bounds = array<i64: 1, 32>}, {pipeline_mode = #tpu.pipeline_mode<synchronous>, transform_indices = @transform_8, window_bounds = array<i64: 32, 128>}, {pipeline_mode = #tpu.pipeline_mode<synchronous>, transform_indices = @transform_9, window_bounds = array<i64: 1, 128>}, {transform_indices = @transform_10, window_bounds = array<i64: 8, 128>}]} {
    %c0 = arith.constant 0 : index
    %c0_0 = arith.constant 0 : index
    %0 = vector.load %arg1[%c0, %c0_0] : memref<8x1xi32, #tpu.memory_space<vmem>>, vector<8x1xi32>
    %1 = tpu.iota {dimensions = array<i32: 1>} : vector<8x128xi32>
    %2 = vector.broadcast %0 : vector<8x1xi32> to vector<8x128xi32>
    %3 = arith.cmpi eq, %1, %2 : vector<8x128xi32>
    %4 = arith.extui %3 : vector<8x128xi1> to vector<8x128xi32>
    %5 = arith.sitofp %4 : vector<8x128xi32> to vector<8x128xf32>
    %6 = arith.truncf %5 : vector<8x128xf32> to vector<8x128xbf16>
    %c0_1 = arith.constant 0 : index
    %c0_2 = arith.constant 0 : index
    %7 = vector.load %arg2[%c0_1, %c0_2] : memref<128x32xbf16, #tpu.memory_space<vmem>>, vector<128x32xbf16>
    %cst = arith.constant dense<0.000000e+00> : vector<8x32xf32>
    %8 = tpu.matmul %6, %7, %cst {dimension_numbers = #tpu.dot_dimension_numbers<[1], [0], [0], [1], [0, 0, 1, 1], [], []>} : vector<8x128xbf16>, vector<128x32xbf16>, vector<8x32xf32> -> vector<8x32xf32>
    %9 = arith.truncf %8 : vector<8x32xf32> to vector<8x32xbf16>
    %c0_3 = arith.constant 0 : index
    %c0_4 = arith.constant 0 : index
    %10 = vector.load %arg3[%c0_3, %c0_4] : memref<32x32xbf16, #tpu.memory_space<vmem>>, vector<32x32xbf16>
    %cst_5 = arith.constant dense<0.000000e+00> : vector<8x32xf32>
    %11 = tpu.matmul %9, %10, %cst_5 {dimension_numbers = #tpu.dot_dimension_numbers<[1], [0], [0], [1], [0, 0, 1, 1], [], []>} : vector<8x32xbf16>, vector<32x32xbf16>, vector<8x32xf32> -> vector<8x32xf32>
    %c0_6 = arith.constant 0 : index
    %c0_7 = arith.constant 0 : index
    %12 = vector.load %arg4[%c0_6, %c0_7] : memref<1x32xf32, #tpu.memory_space<vmem>>, vector<1x32xf32>
    %13 = vector.broadcast %12 : vector<1x32xf32> to vector<8x32xf32>
    %14 = arith.addf %11, %13 : vector<8x32xf32>
    %cst_8 = arith.constant 0.000000e+00 : f32
    %15 = vector.broadcast %cst_8 : f32 to vector<8x32xf32>
    %16 = arith.maximumf %14, %15 : vector<8x32xf32>
    %17 = arith.truncf %16 : vector<8x32xf32> to vector<8x32xbf16>
    %c0_9 = arith.constant 0 : index
    %c0_10 = arith.constant 0 : index
    %18 = vector.load %arg5[%c0_9, %c0_10] : memref<32x64xbf16, #tpu.memory_space<vmem>>, vector<32x64xbf16>
    %cst_11 = arith.constant dense<0.000000e+00> : vector<8x64xf32>
    %19 = tpu.matmul %17, %18, %cst_11 {dimension_numbers = #tpu.dot_dimension_numbers<[1], [0], [0], [1], [0, 0, 1, 1], [], []>} : vector<8x32xbf16>, vector<32x64xbf16>, vector<8x64xf32> -> vector<8x64xf32>
    %c0_12 = arith.constant 0 : index
    %c0_13 = arith.constant 0 : index
    %20 = vector.load %arg6[%c0_12, %c0_13] : memref<1x64xf32, #tpu.memory_space<vmem>>, vector<1x64xf32>
    %21 = vector.broadcast %20 : vector<1x64xf32> to vector<8x64xf32>
    %22 = arith.addf %19, %21 : vector<8x64xf32>
    %cst_14 = arith.constant 0.000000e+00 : f32
    %23 = vector.broadcast %cst_14 : f32 to vector<8x64xf32>
    %24 = arith.maximumf %22, %23 : vector<8x64xf32>
    %25 = arith.truncf %24 : vector<8x64xf32> to vector<8x64xbf16>
    %c0_15 = arith.constant 0 : index
    %c0_16 = arith.constant 0 : index
    %26 = vector.load %arg7[%c0_15, %c0_16] : memref<64x32xbf16, #tpu.memory_space<vmem>>, vector<64x32xbf16>
    %cst_17 = arith.constant dense<0.000000e+00> : vector<8x32xf32>
    %27 = tpu.matmul %25, %26, %cst_17 {dimension_numbers = #tpu.dot_dimension_numbers<[1], [0], [0], [1], [0, 0, 1, 1], [], []>} : vector<8x64xbf16>, vector<64x32xbf16>, vector<8x32xf32> -> vector<8x32xf32>
    %c0_18 = arith.constant 0 : index
    %c0_19 = arith.constant 0 : index
    %28 = vector.load %arg8[%c0_18, %c0_19] : memref<1x32xf32, #tpu.memory_space<vmem>>, vector<1x32xf32>
    %29 = vector.broadcast %28 : vector<1x32xf32> to vector<8x32xf32>
    %30 = arith.addf %27, %29 : vector<8x32xf32>
    %cst_20 = arith.constant 0.000000e+00 : f32
    %31 = vector.broadcast %cst_20 : f32 to vector<8x32xf32>
    %32 = arith.maximumf %30, %31 : vector<8x32xf32>
    %33 = arith.truncf %32 : vector<8x32xf32> to vector<8x32xbf16>
    %c0_21 = arith.constant 0 : index
    %c0_22 = arith.constant 0 : index
    %34 = vector.load %arg9[%c0_21, %c0_22] : memref<32x128xbf16, #tpu.memory_space<vmem>>, vector<32x128xbf16>
    %cst_23 = arith.constant dense<0.000000e+00> : vector<8x128xf32>
    %35 = tpu.matmul %33, %34, %cst_23 {dimension_numbers = #tpu.dot_dimension_numbers<[1], [0], [0], [1], [0, 0, 1, 1], [], []>} : vector<8x32xbf16>, vector<32x128xbf16>, vector<8x128xf32> -> vector<8x128xf32>
    %c0_24 = arith.constant 0 : index
    %c0_25 = arith.constant 0 : index
    %36 = vector.load %arg10[%c0_24, %c0_25] : memref<1x128xf32, #tpu.memory_space<vmem>>, vector<1x128xf32>
    %37 = vector.broadcast %36 : vector<1x128xf32> to vector<8x128xf32>
    %38 = arith.addf %35, %37 : vector<8x128xf32>
    %c0_26 = arith.constant 0 : index
    %c0_27 = arith.constant 0 : index
    %39 = vector.load %arg11[%c0_26, %c0_27] : memref<8x128xf32, #tpu.memory_space<vmem>>, vector<8x128xf32>
    tpu.vector_store %arg11[%c0_26, %c0_27], %38 {strides = array<i32>} : memref<8x128xf32, #tpu.memory_space<vmem>>, vector<8x128xf32>,
    return
  }
  func.func @transform_0(%arg0: i32) -> (i32, i32) {
    %c0_i32 = arith.constant 0 : i32
    %c0_i32_0 = arith.constant 0 : i32
    return %arg0, %c0_i32 : i32, i32
  }
  func.func @transform_1(%arg0: i32) -> (i32, i32) {
    %c0_i32 = arith.constant 0 : i32
    %c0_i32_0 = arith.constant 0 : i32
    %c0_i32_1 = arith.constant 0 : i32
    return %c0_i32, %c0_i32_0 : i32, i32
  }
  func.func @transform_2(%arg0: i32) -> (i32, i32) {
    %c0_i32 = arith.constant 0 : i32
    %c0_i32_0 = arith.constant 0 : i32
    %c0_i32_1 = arith.constant 0 : i32
    return %c0_i32, %c0_i32_0 : i32, i32
  }
  func.func @transform_3(%arg0: i32) -> (i32, i32) {
    %c0_i32 = arith.constant 0 : i32
    %c0_i32_0 = arith.constant 0 : i32
    %c0_i32_1 = arith.constant 0 : i32
    return %c0_i32, %c0_i32_0 : i32, i32
  }
  func.func @transform_4(%arg0: i32) -> (i32, i32) {
    %c0_i32 = arith.constant 0 : i32
    %c0_i32_0 = arith.constant 0 : i32
    %c0_i32_1 = arith.constant 0 : i32
    return %c0_i32, %c0_i32_0 : i32, i32
  }
  func.func @transform_5(%arg0: i32) -> (i32, i32) {
    %c0_i32 = arith.constant 0 : i32
    %c0_i32_0 = arith.constant 0 : i32
    %c0_i32_1 = arith.constant 0 : i32
    return %c0_i32, %c0_i32_0 : i32, i32
  }
  func.func @transform_6(%arg0: i32) -> (i32, i32) {
    %c0_i32 = arith.constant 0 : i32
    %c0_i32_0 = arith.constant 0 : i32
    %c0_i32_1 = arith.constant 0 : i32
    return %c0_i32, %c0_i32_0 : i32, i32
  }
  func.func @transform_7(%arg0: i32) -> (i32, i32) {
    %c0_i32 = arith.constant 0 : i32
    %c0_i32_0 = arith.constant 0 : i32
    %c0_i32_1 = arith.constant 0 : i32
    return %c0_i32, %c0_i32_0 : i32, i32
  }
  func.func @transform_8(%arg0: i32) -> (i32, i32) {
    %c0_i32 = arith.constant 0 : i32
    %c0_i32_0 = arith.constant 0 : i32
    %c0_i32_1 = arith.constant 0 : i32
    return %c0_i32, %c0_i32_0 : i32, i32
  }
  func.func @transform_9(%arg0: i32) -> (i32, i32) {
    %c0_i32 = arith.constant 0 : i32
    %c0_i32_0 = arith.constant 0 : i32
    %c0_i32_1 = arith.constant 0 : i32
    return %c0_i32, %c0_i32_0 : i32, i32
  }
  func.func @transform_10(%arg0: i32) -> (i32, i32) {
    %c0_i32 = arith.constant 0 : i32
    %c0_i32_0 = arith.constant 0 : i32
    return %arg0, %c0_i32 : i32, i32
  }
}

</mosaic_0001>

<bundles_post_ra>
// kernel: tpu_custom_call.1
= control target key start
LH: loop header
LB: loop body
LE: loop exit
PB: predicated region body
PF: predicated region fallthrough
CT: control target
= control target key end

     0   :  { %15 = vsyncpa [#allocation3], 0  ;;  %s1331_s0 = inlined_call_operand.vmem [shape: s32[16,1], index: 0, kind: input, shape index: {}]   ;;  %s1332_s1 = inlined_call_operand.vmem [shape: bf16[128,32], index: 1, kind: input, shape index: {}]   ;;  %s1333_s2 = inlined_call_operand.vmem [shape: bf16[32,32], index: 2, kind: input, shape index: {}]   ;;  %s1334_s3 = inlined_call_operand.vmem [shape: f32[1,32], index: 3, kind: input, shape index: {}]   ;;  %s1335_s4 = inlined_call_operand.vmem [shape: bf16[32,64], index: 4, kind: input, shape index: {}]   ;;  %s1336_s5 = inlined_call_operand.vmem [shape: f32[1,64], index: 5, kind: input, shape index: {}]   ;;  %s1337_s6 = inlined_call_operand.vmem [shape: bf16[64,32], index: 6, kind: input, shape index: {}]   ;;  %s1338_s7 = inlined_call_operand.vmem [shape: f32[1,32], index: 7, kind: input, shape index: {}]   ;;  %s1339_s8 = inlined_call_operand.vmem [shape: bf16[32,128], index: 8, kind: input, shape index: {}]   ;;  %s1340_s9 = inlined_call_operand.vmem [shape: f32[1,128], index: 9, kind: input, shape index: {}]   ;;  %s1341_s10 = inlined_call_operand.hbm [shape: f32[16,128], index: 10, kind: output, shape index: {}]  }
   0x1   :  { %17 = vsyncpa [#allocation3 + $0x1], 0  ;;  %s1135_s13 = smov 0   ;;  %s1137_s14 = smov 0  }
   0x2   :  { %s1139_s15 = smov 0   ;;  %s1141_s16 = smov 0  }
   0x3 LB: > { %s1156_s17 = sadd.s32 4294967295, %s1073_s16   ;;  %s833_s18 = sadd.s32 4294967294, %s1073_s16   ;;  %s1073_s16 = sphi %s1141_s16, %s1347_s16   ;;  %s1069_s15 = sphi %s1139_s15, %s1346_s15   ;;  %s1065_s14 = sphi %s1137_s14, %s1345_s14   ;;  %s1061_s13 = sphi %s1135_s13, %s1344_s13  }
   0x4   : > { %s1160_s19 = sadd.s32 1, %s1073_s16   ;;  %s245_s20 = sadd.s32 1, %s1069_s15 }
   0x5   : > { %s242_s21 = ssub.s32 %s1073_s16, %s1160_s19  ;;  %p255_p0 = scmp.ne.s32.totalorder %s1069_s15, %s1065_s14 }
   0x6   : > { %p243_p1 = scmp.eq.s32.totalorder %s242_s21, 0  ;;  %p256_p2 = scmp.eq.s32.totalorder %s1156_s17, 1 }
   0x7   : > { %p261_p3 = scmp.ne.s32.totalorder %s1065_s14, %s1061_s13  ;;  %p262_p4 = scmp.eq.s32.totalorder %s833_s18, 1 }
   0x8   : > { %s1171_s22 = scalar_select %p243_p1, %s1069_s15, %s245_s20  }
   0x9   : > { %p1173_p5 = por %p256_p2, %p255_p0  ;;  %p1177_p6 = por %p262_p4, %p261_p3 }
   0xa   : > { %p836_p7 = scmp.ge.s32.totalorder %s1073_s16, 1  ;;  %p314_p8 = scmp.lt.s32.totalorder %s1073_s16, 3 }
   0xc   : > { %p315_p9 = pnand %p836_p7, %p314_p8 }
   0xd   : > { %p351_p10 = scmp.lt.s32.totalorder (!%p315_p9), %s1156_s17, 1  ;;  %s348_s28 = sand.u32 (!%p315_p9), 1, %s1065_s14  }
   0xe   : > { %318 = sbr.rel (%p315_p9) target bundleno = 1151 (0x47f), region = 60  ;;  %s837_s29 = sshll.u32 (!%p315_p9), %s348_s28, 3 }
   0xf   : > { %s869_s12 = sshll.u32 (!%p315_p9), %s1156_s17, 7 }
  0x10   : > { %s1290_s26 = scalar_lea.hbm (!%p315_p9), %s1341_s10, %s869_s12 }
  0x13   : > { %v995_v0 = vld [vmem:[%s1332_s1 + $0x38] sm:$0xff]   ;;  %v1075_v1 = vmov 0   ;;  %v1076_v2 = vmov 0.0   ;;  %s352_s27 = scalar_select %p351_p10, %s1156_s17, 1  ;;  %v996_v3 = vld [vmem:[%s1332_s1 + $0x30] sm:$0xff]   ;;  %v997_v5 = vld [vmem:[%s1332_s1 + $0x28] sm:$0xff]   ;;  %v357_v12 = vlaneseq }
  0x14   : > { %994 = vset.pattern.permute.xlu0 %v1075_v1  ;;  %895 = vmatprep.subr.bf16.mxu0 %v1076_v2  ;;  %vm1077_vm0 = vmmov 0   ;;  %v998_v6 = vld [vmem:[%s1332_s1 + $0x20] sm:$0xff]   ;;  %v1003_v7 = vld [vmem:[%s1333_s2 + $0x8] sm:$0xff]   ;;  %v999_v8 = vld [vmem:[%s1332_s1 + $0x18] sm:$0xff]   ;;  %v1078_v15 = vmov 1.0|1.0  }
  0x15   : > { %896 = vmatpush3.bf16.msra.mxu0 %v995_v0  ;;  %915 = vmatprep.subr.bf16.mxu1 %v1076_v2  ;;  %s838_s30 = sshll.u32 %s352_s27, 3  ;;  %v1000_v9 = vld [vmem:[%s1332_s1 + $0x10] sm:$0xff]   ;;  %v1001_v10 = vld [vmem:[%s1332_s1 + $0x8] sm:$0xff]   ;;  %v1002_v11 = vld [vmem:[%s1332_s1] sm:$0xff]   ;;  %v358_v13 = vand.u32 127, %v357_v12  ;;  %vm494_vm3 = vcmask 261120  }
  0x16   : > { %897 = vmatprep.subr.bf16.mxu0 %v1076_v2  ;;  %s354_s18 = scalar_lea.vmem %s1331_s0, %s838_s30  ;;  %911 = vmatprep.mubr.msk.bf16.mxu0 %vm1077_vm0, %v1076_v2  ;;  %v1004_v16 = vld [vmem:[%s1333_s2] sm:$0xff]   ;;  %v1005_v18 = vld [vmem:[%s1335_s4 + $0x8] sm:$0xff]   ;;  %v1007_v30 = vld [vmem:[%s1337_s6 + $0x18] sm:$0xff]   ;;  %vm647_vm4 = vcmask 523264   ;;  %s761_s27 = scalar_lea.sflag [#allocation3], %s348_s28 }
  0x17   : > { %v356_v4 = vld [vmem:[%s354_s18] sm:$0xff]  ;;  %919 = vmatprep.mubr.msk.bf16.mxu1 %vm1077_vm0, %v1076_v2  ;;  %916 = vmatpush3.bf16.msra.mxu1 %v1003_v7  ;;  %v1008_v33 = vld [vmem:[%s1337_s6 + $0x10] sm:$0xff]   ;;  %v1009_v34 = vld [vmem:[%s1337_s6 + $0x8] sm:$0xff]   ;;  %s350_s18 = scalar_lea.vmem [#allocation2], %s837_s29  ;;  %s1079_s17 = smov [#allocation2]  }
  0x18   : > { %360 = vperm.xlu0 %994, %v356_v4   ;;  %917 = vmatprep.subr.bf16.mxu1 %v1076_v2  ;;  %v1006_v23 = vld [vmem:[%s1335_s4] sm:$0xff]   ;;  %v1011_v36 = vld [vmem:[%s1339_s8 + $0x8] sm:$0xff]   ;;  %s774_s20 = sshll.u32 %s350_s18, 4  ;;  %s1017_s29 = sshll.u32 %s1079_s17, 4  ;;  %s1292_s20 = int_to_ptr.vmem [resolvable:$true] %s774_s20  ;;  %s1018_s29 = int_to_ptr.vmem [resolvable:$false] %s1017_s29 }
  0x19   : > { %898 = vmatpush3.bf16.msra.mxu0 %v996_v3  ;;  %v850_v24 = vld [vmem:[%s1334_s3] ss:$0 sm:$0xff]  ;;  %s1013_s30 = scalar_lea.vmem %s1292_s20, 128  ;;  %s1019_s11 = scalar_lea.vmem %s1018_s29, 256 }
  0x1a   : > { %899 = vmatprep.subr.bf16.mxu0 %v1076_v2  ;;  %v1010_v35 = vld [vmem:[%s1337_s6] sm:$0xff]   ;;  %p1014_p11 = scmp.ne.s32.totalorder %s1292_s20, %s1013_s30  ;;  %p1020_p0 = scmp.lt.s32.totalorder %s1292_s20, %s1018_s29 }
  0x1b   : > { %918 = vmatpush3.bf16.msra.mxu1 %v1004_v16  ;;  %v854_v37 = vld [vmem:[%s1336_s5] ss:$0 sm:$0xff]  ;;  %p1021_p1 = scmp.lt.s32.totalorder %s1019_s11, %s1013_s30 }
  0x1c   : > { %923 = vmatprep.subr.bf16.mxu1 %v1076_v2  ;;  %v1012_v45 = vld [vmem:[%s1339_s8] sm:$0xff]   ;;  %p1015_p12 = pnand %p1014_p11, %p1173_p5 }
  0x1d   : > { %900 = vmatpush3.bf16.msra.mxu0 %v997_v5  ;;  %v858_v46 = vld [vmem:[%s1338_s7] ss:$0 sm:$0xff]  ;;  %p1022_p2 = por %p1021_p1, %p1020_p0 }
  0x1e   : > { %901 = vmatprep.subr.bf16.mxu0 %v1076_v2  ;;  %v864_v54 = vld [vmem:[%s1340_s9] ss:$0 sm:$0xff]  ;;  %p1016_p13 = pneg %p1015_p12 }
  0x20   : > { %p1023_p3 = pnand %p1022_p2, %p1016_p13 }
  0x21   : > { %902 = vmatpush3.bf16.msra.mxu0 %v998_v6 }
  0x22   : > { %903 = vmatprep.subr.bf16.mxu0 %v1076_v2 }
  0x25   : > { %904 = vmatpush3.bf16.msra.mxu0 %v999_v8 }
  0x26   : > { %905 = vmatprep.subr.bf16.mxu0 %v1076_v2 }
  0x29   : > { %906 = vmatpush3.bf16.msra.mxu0 %v1000_v9 }
  0x2a   : > { %907 = vmatprep.subr.bf16.mxu0 %v1076_v2 }
  0x2d   : > { %908 = vmatpush3.bf16.msra.mxu0 %v1001_v10 }
  0x2e   : > { %909 = vmatprep.subr.bf16.mxu0 %v1076_v2 }
  0x31   : > { %910 = vmatpush3.bf16.msra.mxu0 %v1002_v11 }
  0x32   : > { %943 = vmatprep.subr.bf16.mxu0 %v1076_v2 }
  0x93   : > { %v361_v14 = vpop.permute.xlu0 %360 }
  0x94   : > { %vm362_vm1 = vcmp.eq.s32.totalorder %v358_v13, %v361_v14 }
  0x95   : > { %vm848_vm2 = vmpackc.low %vm362_vm1, %vm362_vm1 }
  0x96   : > { %912 = vmatmul.mubr.msk.bf16.vlgmr.msra.gmra.mxu0 %vm848_vm2, %v1078_v15 }
  0x97   : > { %947 = vmatprep.mubr.msk.bf16.mxu0 %vm1077_vm0, %v1076_v2  ;;  %944 = vmatpush3.bf16.msra.mxu0 %v1011_v36 }
  0x98   : > { %945 = vmatprep.subr.bf16.mxu0 %v1076_v2 }
  0x9b   : > { %946 = vmatpush3.bf16.msra.mxu0 %v1012_v45 }
 0x156   : > { %v464_v17 = vpop.f32.mrf.mxu0 }
 0x157   : > { %v470_v19 = vpack.c.bf16 %v464_v17, %v464_v17 }
 0x158   : > { %v913_v20 = vpop.f32.mrf.mxu0 }
 0x159   : > { %920 = vmatmul.mubr.msk.bf16.vlgmr.msra.gmra.mxu1 %vm494_vm3, %v470_v19 }
 0x15a   : > { %v467_v21 = vpop.f32.mrf.mxu0  ;;  %924 = vmatpush3.bf16.msra.mxu1 %v1005_v18  ;;  %927 = vmatprep.mubr.msk.bf16.mxu1 %vm1077_vm0, %v1076_v2 }
 0x15b   : > { %925 = vmatprep.subr.bf16.mxu1 %v1076_v2 }
 0x15c   : > { %v914_v22 = vpop.f32.mrf.mxu0 }
 0x15e   : > { %926 = vmatpush3.bf16.msra.mxu1 %v1006_v23 }
 0x15f   : > { %931 = vmatprep.subr.bf16.mxu1 %v1076_v2 }
 0x219   : > { %v532_v25 = vpop.f32.mrf.mxu1 }
 0x21a   : > { %v533_v26 = vadd.f32 %v850_v24, %v532_v25 }
 0x21b   : > { %v921_v27 = vpop.f32.mrf.mxu1 }
 0x21c   : > { %v538_v28 = vmax.f32 %v533_v26, 0.0 }
 0x21d   : > { %v535_v29 = vpop.f32.mrf.mxu1 }
 0x21e   : > { %v539_v31 = vpack.c.bf16 %v538_v28, %v538_v28 }
 0x21f   : > { %v922_v32 = vpop.f32.mrf.mxu1 }
 0x220   : > { %928 = vmatmul.mubr.msk.bf16.vlgmr.msra.gmra.mxu1 %vm494_vm3, %v539_v31 }
 0x221   : > { %932 = vmatpush3.bf16.msra.mxu1 %v1007_v30  ;;  %939 = vmatprep.mubr.msk.bf16.mxu1 %vm1077_vm0, %v1076_v2 }
 0x222   : > { %933 = vmatprep.subr.bf16.mxu1 %v1076_v2 }
 0x225   : > { %934 = vmatpush3.bf16.msra.mxu1 %v1008_v33 }
 0x226   : > { %935 = vmatprep.subr.bf16.mxu1 %v1076_v2 }
 0x229   : > { %936 = vmatpush3.bf16.msra.mxu1 %v1009_v34 }
 0x22a   : > { %937 = vmatprep.subr.bf16.mxu1 %v1076_v2 }
 0x22d   : > { %938 = vmatpush3.bf16.msra.mxu1 %v1010_v35 }
 0x2e0   : > { %v600_v38 = vpop.f32.mrf.mxu1 }
 0x2e1   : > { %v601_v39 = vadd.f32 %v854_v37, %v600_v38 }
 0x2e2   : > { %v929_v40 = vpop.f32.mrf.mxu1 }
 0x2e3   : > { %v606_v41 = vmax.f32 %v601_v39, 0.0 }
 0x2e4   : > { %v603_v42 = vpop.f32.mrf.mxu1 }
 0x2e5   : > { %v607_v43 = vpack.c.bf16 %v606_v41, %v606_v41 }
 0x2e6   : > { %v930_v44 = vpop.f32.mrf.mxu1 }
 0x2e7   : > { %940 = vmatmul.mubr.msk.bf16.vlgmr.msra.gmra.mxu1 %vm647_vm4, %v607_v43 }
 0x3a7   : > { %v685_v47 = vpop.f32.mrf.mxu1 }
 0x3a8   : > { %v686_v48 = vadd.f32 %v858_v46, %v685_v47 }
 0x3a9   : > { %v941_v49 = vpop.f32.mrf.mxu1 }
 0x3aa   : > { %v691_v50 = vmax.f32 %v686_v48, 0.0 }
 0x3ab   : > { %v688_v51 = vpop.f32.mrf.mxu1 }
 0x3ac   : > { %v692_v52 = vpack.c.bf16 %v691_v50, %v691_v50 }
 0x3ad   : > { %v942_v53 = vpop.f32.mrf.mxu1 }
 0x3ae   : > { %948 = vmatmul.mubr.msk.bf16.vlgmr.msra.gmra.mxu0 %vm494_vm3, %v692_v52 }
 0x46e   : > { %v753_v55 = vpop.f32.mrf.mxu0 }
 0x46f   : > { %v754_v56 = vadd.f32 %v864_v54, %v753_v55 }
 0x470   : > { %v949_v57 = vpop.f32.mrf.mxu0 }
 0x471   : > { %759 = vst [vmem:[%s350_s18] sm:$0xff] %v754_v56 }
 0x472   : > { %v756_v58 = vpop.f32.mrf.mxu0 }
 0x473   : > { %1026 = shalt.err (!%p1023_p3)
}
 0x474   : > { %s1027_s12 = scalar_lea.hbm %s1290_s26, 128  ;;  %s1031_s21 = scalar_lea.hbm %s1341_s10, 256 }
 0x475   : > { %p1028_p4 = scmp.ne.s32.totalorder %s1290_s26, %s1027_s12  ;;  %p1032_p9 = scmp.lt.s32.totalorder %s1290_s26, %s1341_s10 }
 0x476   : > { %p1033_p10 = scmp.lt.s32.totalorder %s1031_s21, %s1027_s12 }
 0x477   : > { %p1029_p7 = pnand %p1028_p4, %p1173_p5 }
 0x478   : > { %p1034_p11 = por %p1033_p10, %p1032_p9 }
 0x479   : > { %p1030_p8 = pneg %p1029_p7 }
 0x47b   : > { %p1035_p12 = pnand %p1034_p11, %p1030_p8 }
 0x47d   : > { %1038 = shalt.err (!%p1035_p12)
}
 0x47e   : > { %951 = dma.vmem_to_hbm [thread:$0]  (%p1173_p5), %s1292_s20, 128, %s1290_s26, %s761_s27   ;;  %v950_v59 = vpop.f32.mrf.mxu0 }
 0x47f PF: > { %p957_p13 = scmp.ge.s32.totalorder %s1073_s16, 2  ;;  %s786_s30 = sand.u32 1, %s1061_s13  }
 0x480   : > { %s787_s29 = scalar_lea.sflag [#allocation3], %s786_s30 }
 0x481   : > { %p954_p0 = pnand %p957_p13, %p1177_p6 }
 0x483   : > { %p955_p1 = pneg %p954_p0 }
 0x485   : > { %1056 = dma.done.wait (%p955_p1), %s787_s29, 128  }
 0x486   : > { %1058 = vsyncadd (%p955_p1), %s787_s29, 4294967168  ;;  %p20_p2 = scmp.ge.s32.totalorder %s1160_s19, 4   ;;  %s1344_s13 = smov %s1065_s14 }
 0x487   : > { %s1345_s14 = smov %s1069_s15  ;;  %s1346_s15 = smov %s1171_s22 }
 0x488   : > { %s1347_s16 = smov %s1160_s19  ;;  %22 = sbr.rel (!%p20_p2) target bundleno = 3 (0x3), region = 95 }
 0x48d   :  { %792 = vsyncpa [#allocation3], 1 }
 0x48e   :  { %794 = vsyncpa [#allocation3 + $0x1], 1 }

</bundles_post_ra>
